<compile_context>
chip_gen: v7x
topology: tpu7x:2x2x1
jax: 0.10.0
libtpu: 0.0.40
codegen_flags: <defaults>
</compile_context>

<pallas_src>
import jax
import jax.numpy as jnp
from jax.experimental import pallas as pl
from jax.experimental.pallas import tpu as pltpu

LN_EPS = 1e-5  # PyTorch nn.LayerNorm default


def _round_up(n, m):
    return ((n + m - 1) // m) * m


def _make_ffn_kernel(d_model_real, d_model_pad):
    """Kernel closure; d_model_real is the un-padded feature width for LayerNorm."""
    padded = d_model_pad != d_model_real
    inv_n = 1.0 / float(d_model_real)

    def ffn_kernel(x_ref, w1_ref, b1_ref, w2_ref, b2_ref, g_ref, beta_ref, o_ref):
        # x tile: (tile_m, d_model_pad) in its native dtype (bf16 stays bf16 for MXU).
        xv = x_ref[...]

        # First linear + ReLU (MXU matmul, f32 accumulation).
        h = jnp.dot(xv, w1_ref[...], preferred_element_type=jnp.float32)
        h = jnp.maximum(h + b1_ref[...].astype(jnp.float32), 0.0)

        # Second linear (feed MXU in the weight dtype; accumulate f32).
        y = jnp.dot(h.astype(w2_ref.dtype), w2_ref[...],
                    preferred_element_type=jnp.float32)

        # Bias + residual (f32 epilogue).
        y = y + b2_ref[...].astype(jnp.float32) + xv.astype(jnp.float32)

        # LayerNorm over the real d_model lanes (padded lanes of y are exactly 0).
        if padded:
            lane = jax.lax.broadcasted_iota(jnp.int32, y.shape, dimension=1)
            mask = lane < d_model_real
            mean = jnp.sum(y, axis=-1, keepdims=True) * inv_n
            centered = jnp.where(mask, y - mean, 0.0)
            var = jnp.sum(centered * centered, axis=-1, keepdims=True) * inv_n
        else:
            mean = jnp.mean(y, axis=-1, keepdims=True)
            centered = y - mean
            var = jnp.mean(centered * centered, axis=-1, keepdims=True)

        y_hat = centered * jax.lax.rsqrt(var + LN_EPS)
        out = y_hat * g_ref[...].astype(jnp.float32) + beta_ref[...].astype(jnp.float32)

        o_ref[...] = out.astype(o_ref.dtype)

    return ffn_kernel


def positionwise_ffn(x, w1, b1, w2, b2, gamma, beta, *, tile_m=256):
    """x: (batch, seq, d_model) -> (batch, seq, d_model)."""
    batch, seq, d_model = x.shape
    d_ff = w1.shape[1]
    M = batch * seq

    # Lane-dense padding of the feature dims, row padding to a tile_m multiple.
    Dp = _round_up(d_model, 128)
    Fp = _round_up(d_ff, 128)
    tile_m = max(8, min(tile_m, _round_up(M, 8)))
    M_pad = _round_up(M, tile_m)

    x2d = jnp.pad(x.reshape(M, d_model), ((0, M_pad - M), (0, Dp - d_model)))
    w1p = jnp.pad(w1, ((0, Dp - d_model), (0, Fp - d_ff)))
    b1p = jnp.pad(b1, ((0, Fp - d_ff),)).reshape(1, Fp)
    w2p = jnp.pad(w2, ((0, Fp - d_ff), (0, Dp - d_model)))
    b2p = jnp.pad(b2, ((0, Dp - d_model),)).reshape(1, Dp)
    gp = jnp.pad(gamma, ((0, Dp - d_model),)).reshape(1, Dp)
    bp = jnp.pad(beta, ((0, Dp - d_model),)).reshape(1, Dp)

    # Rough VMEM budget: weights (worst case 2 bufs) + double-buffered x/out
    # tiles + f32 (tile_m, Fp) intermediate + epilogue temporaries.
    wsz = jnp.dtype(w1.dtype).itemsize
    xsz = jnp.dtype(x.dtype).itemsize
    weight_bytes = (2 * Dp * Fp + 2 * Fp + 6 * Dp) * wsz
    act_bytes = 2 * 2 * tile_m * Dp * xsz
    scratch_bytes = tile_m * Fp * 4 + 2 * tile_m * Dp * 4
    vmem_need = 2 * weight_bytes + act_bytes + scratch_bytes
    vmem_limit = int(min(96 * 2**20, max(32 * 2**20, int(1.5 * vmem_need))))

    kernel = _make_ffn_kernel(d_model, Dp)
    grid = (M_pad // tile_m,)

    def build(single_buffer_weights):
        def const_spec(shape):
            idx = lambda i: (0, 0)
            if single_buffer_weights:
                # Constant index_map -> never re-fetched; one VMEM buffer is enough.
                return pl.BlockSpec(shape, idx, pipeline_mode=pl.Buffered(1))
            return pl.BlockSpec(shape, idx)

        return pl.pallas_call(
            kernel,
            out_shape=jax.ShapeDtypeStruct((M_pad, Dp), x.dtype),
            grid_spec=pltpu.PrefetchScalarGridSpec(
                num_scalar_prefetch=0,
                grid=grid,
                in_specs=[
                    pl.BlockSpec((tile_m, Dp), lambda i: (i, 0)),  # x rows
                    const_spec((Dp, Fp)),                          # W1 (full, resident)
                    const_spec((1, Fp)),                           # b1
                    const_spec((Fp, Dp)),                          # W2 (full, resident)
                    const_spec((1, Dp)),                           # b2
                    const_spec((1, Dp)),                           # gamma
                    const_spec((1, Dp)),                           # beta
                ],
                out_specs=pl.BlockSpec((tile_m, Dp), lambda i: (i, 0)),
            ),
            compiler_params=pltpu.CompilerParams(
                dimension_semantics=("parallel",),
                vmem_limit_bytes=vmem_limit,
            ),
        )

    args = (x2d, w1p, b1p, w2p, b2p, gp, bp)
    try:
        out2d = build(True)(*args)
    except Exception:
        # Fallback for JAX versions where pipeline_mode=pl.Buffered(1) is not
        # supported on this path; identical semantics, just double-buffered weights.
        out2d = build(False)(*args)

    return out2d[:M, :d_model].reshape(batch, seq, d_model)


def _reference(x, w1, b1, w2, b2, gamma, beta):
    h = jnp.maximum(x @ w1 + b1, 0.0)
    y = h @ w2 + b2
    y = y + x
    mean = jnp.mean(y, axis=-1, keepdims=True)
    var = jnp.mean((y - mean) ** 2, axis=-1, keepdims=True)
    return (y - mean) / jnp.sqrt(var + LN_EPS) * gamma + beta


if __name__ == "__main__":
    key = jax.random.PRNGKey(0)
    batch, seq, d_model, d_ff = 2, 8, 32, 64

    k = jax.random.split(key, 5)
    x = jax.random.normal(k[0], (batch, seq, d_model), dtype=jnp.float32)
    # Deterministic parameter init (scaled normals, Linear-like magnitudes)
    w1 = jax.random.normal(k[1], (d_model, d_ff), dtype=jnp.float32) / jnp.sqrt(d_model)
    b1 = jax.random.normal(k[2], (d_ff,), dtype=jnp.float32) * 0.01
    w2 = jax.random.normal(k[3], (d_ff, d_model), dtype=jnp.float32) / jnp.sqrt(d_ff)
    b2 = jax.random.normal(k[4], (d_model,), dtype=jnp.float32) * 0.01
    gamma = jnp.ones((d_model,), dtype=jnp.float32)
    beta = jnp.zeros((d_model,), dtype=jnp.float32)

    out = positionwise_ffn(x, w1, b1, w2, b2, gamma, beta)
    out = jax.block_until_ready(out)

    ref = _reference(x, w1, b1, w2, b2, gamma, beta)
    assert out.shape == (batch, seq, d_model)
    assert jnp.allclose(out, ref, atol=2e-4, rtol=2e-4), (
        "mismatch vs reference: max abs diff = "
        f"{float(jnp.max(jnp.abs(out - ref)))}")

    print("KERNEL_OK")
</pallas_src>

<mosaic_0001>
module attributes {stable_mosaic.version = 11 : i64} {
  func.func @ffn_kernel(%arg0: i32, %arg1: memref<16x128xf32, #tpu.memory_space<vmem>>, %arg2: memref<128x128xf32, #tpu.memory_space<vmem>>, %arg3: memref<1x128xf32, #tpu.memory_space<vmem>>, %arg4: memref<128x128xf32, #tpu.memory_space<vmem>>, %arg5: memref<1x128xf32, #tpu.memory_space<vmem>>, %arg6: memref<1x128xf32, #tpu.memory_space<vmem>>, %arg7: memref<1x128xf32, #tpu.memory_space<vmem>>, %arg8: memref<16x128xf32, #tpu.memory_space<vmem>>) attributes {dimension_semantics = [#tpu.dimension_semantics<parallel>], iteration_bounds = array<i64: 1>, scalar_prefetch = 0 : i64, scratch_operands = 0 : i64, tpu.core_type = #tpu.core_type<tc>, window_params = [{transform_indices = @transform_0, window_bounds = array<i64: 16, 128>}, {pipeline_mode = #tpu.pipeline_mode<synchronous>, transform_indices = @transform_1, window_bounds = array<i64: 128, 128>}, {pipeline_mode = #tpu.pipeline_mode<synchronous>, transform_indices = @transform_2, window_bounds = array<i64: 1, 128>}, {pipeline_mode = #tpu.pipeline_mode<synchronous>, transform_indices = @transform_3, window_bounds = array<i64: 128, 128>}, {pipeline_mode = #tpu.pipeline_mode<synchronous>, transform_indices = @transform_4, window_bounds = array<i64: 1, 128>}, {pipeline_mode = #tpu.pipeline_mode<synchronous>, transform_indices = @transform_5, window_bounds = array<i64: 1, 128>}, {pipeline_mode = #tpu.pipeline_mode<synchronous>, transform_indices = @transform_6, window_bounds = array<i64: 1, 128>}, {transform_indices = @transform_7, window_bounds = array<i64: 16, 128>}]} {
    %c0 = arith.constant 0 : index
    %c0_0 = arith.constant 0 : index
    %0 = vector.load %arg1[%c0, %c0_0] : memref<16x128xf32, #tpu.memory_space<vmem>>, vector<16x128xf32>
    %c0_1 = arith.constant 0 : index
    %c0_2 = arith.constant 0 : index
    %1 = vector.load %arg2[%c0_1, %c0_2] : memref<128x128xf32, #tpu.memory_space<vmem>>, vector<128x128xf32>
    %cst = arith.constant dense<0.000000e+00> : vector<16x128xf32>
    %2 = tpu.matmul %0, %1, %cst {dimension_numbers = #tpu.dot_dimension_numbers<[1], [0], [0], [1], [0, 0, 1, 1], [], []>} : vector<16x128xf32>, vector<128x128xf32>, vector<16x128xf32> -> vector<16x128xf32>
    %c0_3 = arith.constant 0 : index
    %c0_4 = arith.constant 0 : index
    %3 = vector.load %arg3[%c0_3, %c0_4] : memref<1x128xf32, #tpu.memory_space<vmem>>, vector<1x128xf32>
    %4 = vector.broadcast %3 : vector<1x128xf32> to vector<16x128xf32>
    %5 = arith.addf %2, %4 : vector<16x128xf32>
    %cst_5 = arith.constant 0.000000e+00 : f32
    %6 = vector.broadcast %cst_5 : f32 to vector<16x128xf32>
    %7 = arith.maximumf %5, %6 : vector<16x128xf32>
    %c0_6 = arith.constant 0 : index
    %c0_7 = arith.constant 0 : index
    %8 = vector.load %arg4[%c0_6, %c0_7] : memref<128x128xf32, #tpu.memory_space<vmem>>, vector<128x128xf32>
    %cst_8 = arith.constant dense<0.000000e+00> : vector<16x128xf32>
    %9 = tpu.matmul %7, %8, %cst_8 {dimension_numbers = #tpu.dot_dimension_numbers<[1], [0], [0], [1], [0, 0, 1, 1], [], []>} : vector<16x128xf32>, vector<128x128xf32>, vector<16x128xf32> -> vector<16x128xf32>
    %c0_9 = arith.constant 0 : index
    %c0_10 = arith.constant 0 : index
    %10 = vector.load %arg5[%c0_9, %c0_10] : memref<1x128xf32, #tpu.memory_space<vmem>>, vector<1x128xf32>
    %11 = vector.broadcast %10 : vector<1x128xf32> to vector<16x128xf32>
    %12 = arith.addf %9, %11 : vector<16x128xf32>
    %13 = arith.addf %12, %0 : vector<16x128xf32>
    %14 = tpu.iota {dimensions = array<i32: 1>} : vector<16x128xi32>
    %c32_i32 = arith.constant 32 : i32
    %15 = vector.broadcast %c32_i32 : i32 to vector<16x128xi32>
    %16 = arith.cmpi slt, %14, %15 : vector<16x128xi32>
    %cst_11 = arith.constant dense<0.000000e+00> : vector<16xf32>
    %17 = vector.multi_reduction <add>, %13, %cst_11 [1] : vector<16x128xf32> to vector<16xf32>
    %18 = vector.shape_cast %17 : vector<16xf32> to vector<16x1xf32>
    %cst_12 = arith.constant 3.125000e-02 : f32
    %19 = vector.broadcast %cst_12 : f32 to vector<16x1xf32>
    %20 = arith.mulf %18, %19 : vector<16x1xf32>
    %21 = vector.broadcast %20 : vector<16x1xf32> to vector<16x128xf32>
    %22 = arith.subf %13, %21 : vector<16x128xf32>
    %cst_13 = arith.constant 0.000000e+00 : f32
    %23 = vector.broadcast %cst_13 : f32 to vector<16x128xf32>
    %24 = arith.select %16, %22, %23 : vector<16x128xi1>, vector<16x128xf32>
    %25 = arith.mulf %24, %24 : vector<16x128xf32>
    %cst_14 = arith.constant dense<0.000000e+00> : vector<16xf32>
    %26 = vector.multi_reduction <add>, %25, %cst_14 [1] : vector<16x128xf32> to vector<16xf32>
    %27 = vector.shape_cast %26 : vector<16xf32> to vector<16x1xf32>
    %cst_15 = arith.constant 3.125000e-02 : f32
    %28 = vector.broadcast %cst_15 : f32 to vector<16x1xf32>
    %29 = arith.mulf %27, %28 : vector<16x1xf32>
    %cst_16 = arith.constant 9.99999974E-6 : f32
    %30 = vector.broadcast %cst_16 : f32 to vector<16x1xf32>
    %31 = arith.addf %29, %30 : vector<16x1xf32>
    %32 = math.rsqrt %31 : vector<16x1xf32>
    %33 = vector.broadcast %32 : vector<16x1xf32> to vector<16x128xf32>
    %34 = arith.mulf %24, %33 : vector<16x128xf32>
    %c0_17 = arith.constant 0 : index
    %c0_18 = arith.constant 0 : index
    %35 = vector.load %arg6[%c0_17, %c0_18] : memref<1x128xf32, #tpu.memory_space<vmem>>, vector<1x128xf32>
    %36 = vector.broadcast %35 : vector<1x128xf32> to vector<16x128xf32>
    %37 = arith.mulf %34, %36 : vector<16x128xf32>
    %c0_19 = arith.constant 0 : index
    %c0_20 = arith.constant 0 : index
    %38 = vector.load %arg7[%c0_19, %c0_20] : memref<1x128xf32, #tpu.memory_space<vmem>>, vector<1x128xf32>
    %39 = vector.broadcast %38 : vector<1x128xf32> to vector<16x128xf32>
    %40 = arith.addf %37, %39 : vector<16x128xf32>
    %c0_21 = arith.constant 0 : index
    %c0_22 = arith.constant 0 : index
    %41 = vector.load %arg8[%c0_21, %c0_22] : memref<16x128xf32, #tpu.memory_space<vmem>>, vector<16x128xf32>
    tpu.vector_store %arg8[%c0_21, %c0_22], %40 {strides = array<i32>} : memref<16x128xf32, #tpu.memory_space<vmem>>, vector<16x128xf32>,
    return
  }
  func.func @transform_0(%arg0: i32) -> (i32, i32) {
    %c0_i32 = arith.constant 0 : i32
    %c0_i32_0 = arith.constant 0 : i32
    return %arg0, %c0_i32 : i32, i32
  }
  func.func @transform_1(%arg0: i32) -> (i32, i32) {
    %c0_i32 = arith.constant 0 : i32
    %c0_i32_0 = arith.constant 0 : i32
    %c0_i32_1 = arith.constant 0 : i32
    return %c0_i32, %c0_i32_0 : i32, i32
  }
  func.func @transform_2(%arg0: i32) -> (i32, i32) {
    %c0_i32 = arith.constant 0 : i32
    %c0_i32_0 = arith.constant 0 : i32
    %c0_i32_1 = arith.constant 0 : i32
    return %c0_i32, %c0_i32_0 : i32, i32
  }
  func.func @transform_3(%arg0: i32) -> (i32, i32) {
    %c0_i32 = arith.constant 0 : i32
    %c0_i32_0 = arith.constant 0 : i32
    %c0_i32_1 = arith.constant 0 : i32
    return %c0_i32, %c0_i32_0 : i32, i32
  }
  func.func @transform_4(%arg0: i32) -> (i32, i32) {
    %c0_i32 = arith.constant 0 : i32
    %c0_i32_0 = arith.constant 0 : i32
    %c0_i32_1 = arith.constant 0 : i32
    return %c0_i32, %c0_i32_0 : i32, i32
  }
  func.func @transform_5(%arg0: i32) -> (i32, i32) {
    %c0_i32 = arith.constant 0 : i32
    %c0_i32_0 = arith.constant 0 : i32
    %c0_i32_1 = arith.constant 0 : i32
    return %c0_i32, %c0_i32_0 : i32, i32
  }
  func.func @transform_6(%arg0: i32) -> (i32, i32) {
    %c0_i32 = arith.constant 0 : i32
    %c0_i32_0 = arith.constant 0 : i32
    %c0_i32_1 = arith.constant 0 : i32
    return %c0_i32, %c0_i32_0 : i32, i32
  }
  func.func @transform_7(%arg0: i32) -> (i32, i32) {
    %c0_i32 = arith.constant 0 : i32
    %c0_i32_0 = arith.constant 0 : i32
    return %arg0, %c0_i32 : i32, i32
  }
}

module attributes {stable_mosaic.version = 11 : i64} {
  func.func @ffn_kernel(%arg0: i32, %arg1: memref<16x128xf32, #tpu.memory_space<vmem>>, %arg2: memref<128x128xf32, #tpu.memory_space<vmem>>, %arg3: memref<1x128xf32, #tpu.memory_space<vmem>>, %arg4: memref<128x128xf32, #tpu.memory_space<vmem>>, %arg5: memref<1x128xf32, #tpu.memory_space<vmem>>, %arg6: memref<1x128xf32, #tpu.memory_space<vmem>>, %arg7: memref<1x128xf32, #tpu.memory_space<vmem>>, %arg8: memref<16x128xf32, #tpu.memory_space<vmem>>) attributes {dimension_semantics = [#tpu.dimension_semantics<parallel>], iteration_bounds = array<i64: 1>, scalar_prefetch = 0 : i64, scratch_operands = 0 : i64, tpu.core_type = #tpu.core_type<tc>, window_params = [{transform_indices = @transform_0, window_bounds = array<i64: 16, 128>}, {pipeline_mode = #tpu.pipeline_mode<synchronous>, transform_indices = @transform_1, window_bounds = array<i64: 128, 128>}, {pipeline_mode = #tpu.pipeline_mode<synchronous>, transform_indices = @transform_2, window_bounds = array<i64: 1, 128>}, {pipeline_mode = #tpu.pipeline_mode<synchronous>, transform_indices = @transform_3, window_bounds = array<i64: 128, 128>}, {pipeline_mode = #tpu.pipeline_mode<synchronous>, transform_indices = @transform_4, window_bounds = array<i64: 1, 128>}, {pipeline_mode = #tpu.pipeline_mode<synchronous>, transform_indices = @transform_5, window_bounds = array<i64: 1, 128>}, {pipeline_mode = #tpu.pipeline_mode<synchronous>, transform_indices = @transform_6, window_bounds = array<i64: 1, 128>}, {transform_indices = @transform_7, window_bounds = array<i64: 16, 128>}]} {
    %c0 = arith.constant 0 : index
    %c0_0 = arith.constant 0 : index
    %0 = vector.load %arg1[%c0, %c0_0] : memref<16x128xf32, #tpu.memory_space<vmem>>, vector<16x128xf32>
    %c0_1 = arith.constant 0 : index
    %c0_2 = arith.constant 0 : index
    %1 = vector.load %arg2[%c0_1, %c0_2] : memref<128x128xf32, #tpu.memory_space<vmem>>, vector<128x128xf32>
    %cst = arith.constant dense<0.000000e+00> : vector<16x128xf32>
    %2 = tpu.matmul %0, %1, %cst {dimension_numbers = #tpu.dot_dimension_numbers<[1], [0], [0], [1], [0, 0, 1, 1], [], []>} : vector<16x128xf32>, vector<128x128xf32>, vector<16x128xf32> -> vector<16x128xf32>
    %c0_3 = arith.constant 0 : index
    %c0_4 = arith.constant 0 : index
    %3 = vector.load %arg3[%c0_3, %c0_4] : memref<1x128xf32, #tpu.memory_space<vmem>>, vector<1x128xf32>
    %4 = vector.broadcast %3 : vector<1x128xf32> to vector<16x128xf32>
    %5 = arith.addf %2, %4 : vector<16x128xf32>
    %cst_5 = arith.constant 0.000000e+00 : f32
    %6 = vector.broadcast %cst_5 : f32 to vector<16x128xf32>
    %7 = arith.maximumf %5, %6 : vector<16x128xf32>
    %c0_6 = arith.constant 0 : index
    %c0_7 = arith.constant 0 : index
    %8 = vector.load %arg4[%c0_6, %c0_7] : memref<128x128xf32, #tpu.memory_space<vmem>>, vector<128x128xf32>
    %cst_8 = arith.constant dense<0.000000e+00> : vector<16x128xf32>
    %9 = tpu.matmul %7, %8, %cst_8 {dimension_numbers = #tpu.dot_dimension_numbers<[1], [0], [0], [1], [0, 0, 1, 1], [], []>} : vector<16x128xf32>, vector<128x128xf32>, vector<16x128xf32> -> vector<16x128xf32>
    %c0_9 = arith.constant 0 : index
    %c0_10 = arith.constant 0 : index
    %10 = vector.load %arg5[%c0_9, %c0_10] : memref<1x128xf32, #tpu.memory_space<vmem>>, vector<1x128xf32>
    %11 = vector.broadcast %10 : vector<1x128xf32> to vector<16x128xf32>
    %12 = arith.addf %9, %11 : vector<16x128xf32>
    %13 = arith.addf %12, %0 : vector<16x128xf32>
    %14 = tpu.iota {dimensions = array<i32: 1>} : vector<16x128xi32>
    %c32_i32 = arith.constant 32 : i32
    %15 = vector.broadcast %c32_i32 : i32 to vector<16x128xi32>
    %16 = arith.cmpi slt, %14, %15 : vector<16x128xi32>
    %cst_11 = arith.constant dense<0.000000e+00> : vector<16xf32>
    %17 = vector.multi_reduction <add>, %13, %cst_11 [1] : vector<16x128xf32> to vector<16xf32>
    %18 = vector.shape_cast %17 : vector<16xf32> to vector<16x1xf32>
    %cst_12 = arith.constant 3.125000e-02 : f32
    %19 = vector.broadcast %cst_12 : f32 to vector<16x1xf32>
    %20 = arith.mulf %18, %19 : vector<16x1xf32>
    %21 = vector.broadcast %20 : vector<16x1xf32> to vector<16x128xf32>
    %22 = arith.subf %13, %21 : vector<16x128xf32>
    %cst_13 = arith.constant 0.000000e+00 : f32
    %23 = vector.broadcast %cst_13 : f32 to vector<16x128xf32>
    %24 = arith.select %16, %22, %23 : vector<16x128xi1>, vector<16x128xf32>
    %25 = arith.mulf %24, %24 : vector<16x128xf32>
    %cst_14 = arith.constant dense<0.000000e+00> : vector<16xf32>
    %26 = vector.multi_reduction <add>, %25, %cst_14 [1] : vector<16x128xf32> to vector<16xf32>
    %27 = vector.shape_cast %26 : vector<16xf32> to vector<16x1xf32>
    %cst_15 = arith.constant 3.125000e-02 : f32
    %28 = vector.broadcast %cst_15 : f32 to vector<16x1xf32>
    %29 = arith.mulf %27, %28 : vector<16x1xf32>
    %cst_16 = arith.constant 9.99999974E-6 : f32
    %30 = vector.broadcast %cst_16 : f32 to vector<16x1xf32>
    %31 = arith.addf %29, %30 : vector<16x1xf32>
    %32 = math.rsqrt %31 : vector<16x1xf32>
    %33 = vector.broadcast %32 : vector<16x1xf32> to vector<16x128xf32>
    %34 = arith.mulf %24, %33 : vector<16x128xf32>
    %c0_17 = arith.constant 0 : index
    %c0_18 = arith.constant 0 : index
    %35 = vector.load %arg6[%c0_17, %c0_18] : memref<1x128xf32, #tpu.memory_space<vmem>>, vector<1x128xf32>
    %36 = vector.broadcast %35 : vector<1x128xf32> to vector<16x128xf32>
    %37 = arith.mulf %34, %36 : vector<16x128xf32>
    %c0_19 = arith.constant 0 : index
    %c0_20 = arith.constant 0 : index
    %38 = vector.load %arg7[%c0_19, %c0_20] : memref<1x128xf32, #tpu.memory_space<vmem>>, vector<1x128xf32>
    %39 = vector.broadcast %38 : vector<1x128xf32> to vector<16x128xf32>
    %40 = arith.addf %37, %39 : vector<16x128xf32>
    %c0_21 = arith.constant 0 : index
    %c0_22 = arith.constant 0 : index
    %41 = vector.load %arg8[%c0_21, %c0_22] : memref<16x128xf32, #tpu.memory_space<vmem>>, vector<16x128xf32>
    tpu.vector_store %arg8[%c0_21, %c0_22], %40 {strides = array<i32>} : memref<16x128xf32, #tpu.memory_space<vmem>>, vector<16x128xf32>,
    return
  }
  func.func @transform_0(%arg0: i32) -> (i32, i32) {
    %c0_i32 = arith.constant 0 : i32
    %c0_i32_0 = arith.constant 0 : i32
    return %arg0, %c0_i32 : i32, i32
  }
  func.func @transform_1(%arg0: i32) -> (i32, i32) {
    %c0_i32 = arith.constant 0 : i32
    %c0_i32_0 = arith.constant 0 : i32
    %c0_i32_1 = arith.constant 0 : i32
    return %c0_i32, %c0_i32_0 : i32, i32
  }
  func.func @transform_2(%arg0: i32) -> (i32, i32) {
    %c0_i32 = arith.constant 0 : i32
    %c0_i32_0 = arith.constant 0 : i32
    %c0_i32_1 = arith.constant 0 : i32
    return %c0_i32, %c0_i32_0 : i32, i32
  }
  func.func @transform_3(%arg0: i32) -> (i32, i32) {
    %c0_i32 = arith.constant 0 : i32
    %c0_i32_0 = arith.constant 0 : i32
    %c0_i32_1 = arith.constant 0 : i32
    return %c0_i32, %c0_i32_0 : i32, i32
  }
  func.func @transform_4(%arg0: i32) -> (i32, i32) {
    %c0_i32 = arith.constant 0 : i32
    %c0_i32_0 = arith.constant 0 : i32
    %c0_i32_1 = arith.constant 0 : i32
    return %c0_i32, %c0_i32_0 : i32, i32
  }
  func.func @transform_5(%arg0: i32) -> (i32, i32) {
    %c0_i32 = arith.constant 0 : i32
    %c0_i32_0 = arith.constant 0 : i32
    %c0_i32_1 = arith.constant 0 : i32
    return %c0_i32, %c0_i32_0 : i32, i32
  }
  func.func @transform_6(%arg0: i32) -> (i32, i32) {
    %c0_i32 = arith.constant 0 : i32
    %c0_i32_0 = arith.constant 0 : i32
    %c0_i32_1 = arith.constant 0 : i32
    return %c0_i32, %c0_i32_0 : i32, i32
  }
  func.func @transform_7(%arg0: i32) -> (i32, i32) {
    %c0_i32 = arith.constant 0 : i32
    %c0_i32_0 = arith.constant 0 : i32
    return %arg0, %c0_i32 : i32, i32
  }
}

</mosaic_0001>

<bundles_post_ra>
// kernel: tpu_custom_call.1
= control target key start
LH: loop header
LB: loop body
LE: loop exit
PB: predicated region body
PF: predicated region fallthrough
CT: control target
= control target key end

     0   :  { %12 = vsyncpa [#allocation3], 0  ;;  %s742_s0 = inlined_call_operand.hbm [shape: f32[16,128], index: 0, kind: input, shape index: {}]   ;;  %s743_s1 = inlined_call_operand.hbm [shape: f32[128,128], index: 1, kind: input, shape index: {}]   ;;  %s744_s2 = inlined_call_operand.vmem [shape: f32[1,128], index: 2, kind: input, shape index: {}]   ;;  %s745_s3 = inlined_call_operand.hbm [shape: f32[128,128], index: 3, kind: input, shape index: {}]   ;;  %s746_s4 = inlined_call_operand.vmem [shape: f32[1,128], index: 4, kind: input, shape index: {}]   ;;  %s747_s5 = inlined_call_operand.vmem [shape: f32[1,128], index: 5, kind: input, shape index: {}]   ;;  %s748_s6 = inlined_call_operand.vmem [shape: f32[1,128], index: 6, kind: input, shape index: {}]   ;;  %s749_s7 = inlined_call_operand.hbm [shape: f32[16,128], index: 7, kind: output, shape index: {}]  }
   0x1   :  { %13 = vsyncpa [#allocation6], 0 }
   0x2   :  { %14 = vsyncpa [#allocation4], 0  ;;  %s613_s24 = smov [#allocation5]   ;;  %s614_s26 = smov [#allocation2]  }
   0x3   :  { %s32_s25 = sshll.u32 %s613_s24, 4  ;;  %s20_s27 = sshll.u32 %s614_s26, 4  ;;  %s33_s25 = int_to_ptr.vmem [resolvable:$true] %s32_s25  ;;  %s659_s27 = int_to_ptr.vmem [resolvable:$true] %s20_s27 }
   0x4   :  { %s519_s30 = scalar_lea.hbm %s743_s1, 2048 }
   0x5   :  { %p520_p0 = scmp.ne.s32.totalorder %s743_s1, %s519_s30  ;;  %p523_p1 = scmp.lt.u32.totalorder %s519_s30, %s743_s1 }
   0x7   :  { %p525_p2 = pnand %p523_p1, %p520_p0 }
   0x9   :  { %528 = shalt.err (!%p525_p2)
}
   0xa   :  { %s529_s12 = scalar_lea.vmem %s33_s25, 2048  ;;  %p534_p4 = scmp.lt.s32.totalorder %s33_s25, %s33_s25 }
   0xb   :  { %p530_p3 = scmp.ne.s32.totalorder %s33_s25, %s529_s12  ;;  %p535_p5 = scmp.lt.s32.totalorder %s529_s12, %s529_s12 }
   0xd   :  { %p536_p6 = por %p535_p5, %p534_p4 }
   0xf   :  { %p537_p7 = pnand %p536_p6, %p530_p3 }
  0x11   :  { %540 = shalt.err (!%p537_p7)
}
  0x12   :  { %s615_s13 = smov 128   ;;  %s616_s14 = smov 8  }
  0x13   :  { %38 = dma.hbm_to_vmem [thread:$0]  %s743_s1, 2048, %s33_s25, [#allocation6], %s615_s13, %s615_s13, %s616_s14  }
  0x14   :  { %s541_s19 = scalar_lea.hbm %s742_s0, 256 }
  0x15   :  { %p542_p8 = scmp.ne.s32.totalorder %s742_s0, %s541_s19  ;;  %p545_p9 = scmp.lt.u32.totalorder %s541_s19, %s742_s0 }
  0x17   :  { %p547_p10 = pnand %p545_p9, %p542_p8 }
  0x19   :  { %550 = shalt.err (!%p547_p10)
}
  0x1a   :  { %s551_s24 = scalar_lea.vmem %s659_s27, 256  ;;  %p556_p12 = scmp.lt.s32.totalorder %s659_s27, %s659_s27 }
  0x1b   :  { %p552_p11 = scmp.ne.s32.totalorder %s659_s27, %s551_s24  ;;  %p557_p13 = scmp.lt.s32.totalorder %s551_s24, %s551_s24 }
  0x1d   :  { %p558_p0 = por %p557_p13, %p556_p12 }
  0x1f   :  { %p559_p1 = pnand %p558_p0, %p552_p11 }
  0x21   :  { %562 = shalt.err (!%p559_p1)
}
  0x22   :  { %26 = dma.hbm_to_vmem [thread:$0]  %s742_s0, 256, %s659_s27, [#allocation3], %s615_s13, %s615_s13, %s616_s14  }
  0x23   :  { %s617_s26 = smov [#allocation7]   ;;  %s563_s8 = scalar_lea.hbm %s745_s3, 2048 }
  0x24   :  { %s46_s28 = sshll.u32 %s617_s26, 4  ;;  %p564_p2 = scmp.ne.s32.totalorder %s745_s3, %s563_s8  ;;  %s47_s28 = int_to_ptr.vmem [resolvable:$true] %s46_s28 }
  0x25   :  { %p567_p3 = scmp.lt.u32.totalorder %s563_s8, %s745_s3 }
  0x27   :  { %p569_p4 = pnand %p567_p3, %p564_p2 }
  0x29   :  { %572 = shalt.err (!%p569_p4)
}
  0x2a   :  { %s573_s15 = scalar_lea.vmem %s47_s28, 2048  ;;  %p578_p6 = scmp.lt.s32.totalorder %s47_s28, %s47_s28 }
  0x2b   :  { %p574_p5 = scmp.ne.s32.totalorder %s47_s28, %s573_s15  ;;  %p579_p7 = scmp.lt.s32.totalorder %s573_s15, %s573_s15 }
  0x2d   :  { %p580_p8 = por %p579_p7, %p578_p6 }
  0x2f   :  { %p581_p9 = pnand %p580_p8, %p574_p5 }
  0x31   :  { %584 = shalt.err (!%p581_p9)
}
  0x32   :  { %52 = dma.hbm_to_vmem [thread:$0]  %s745_s3, 2048, %s47_s28, [#allocation6], %s615_s13, %s615_s13, %s616_s14  }
  0x33   :  { %607 = dma.done.wait [#allocation3], 256  }
  0x34   :  { %608 = vsyncadd [#allocation3], 4294967040 }
  0x35   :  { %609 = dma.done.wait [#allocation6], 4096  }
  0x36   :  { %610 = vsyncadd [#allocation6], 4294963200  ;;  %v70_v0 = vld [vmem:[#allocation5] sm:$0xff]  ;;  %v71_v1 = vld [vmem:[#allocation5 + $0x8] sm:$0xff]  ;;  %s618_s21 = smov [#allocation8]  }
  0x37   :  { %v72_v2 = vld [vmem:[#allocation5 + $0x10] sm:$0xff]  ;;  %v445_v3 = vpack.c.bf16 %v71_v1, %v70_v0  ;;  %v73_v4 = vld [vmem:[#allocation5 + $0x18] sm:$0xff]  ;;  %v74_v6 = vld [vmem:[#allocation5 + $0x20] sm:$0xff]  ;;  %v270_v0 = vlaneseq  ;;  %s322_s22 = sshll.u32 %s618_s21, 4  ;;  %s323_s22 = int_to_ptr.vmem [resolvable:$true] %s322_s22 }
  0x38   :  { %v449_v5 = vpack.c.bf16 %v73_v4, %v72_v2  ;;  %v75_v7 = vld [vmem:[#allocation5 + $0x28] sm:$0xff]  ;;  %v76_v9 = vld [vmem:[#allocation5 + $0x30] sm:$0xff]  ;;  %v77_v10 = vld [vmem:[#allocation5 + $0x38] sm:$0xff]  ;;  %s585_s23 = scalar_lea.vmem %s323_s22, 256  ;;  %p590_p11 = scmp.lt.s32.totalorder %s323_s22, %s323_s22 }
  0x39   :  { %446 = vmatprep.subr.bf16.mxu0 %v445_v3  ;;  %v453_v8 = vpack.c.bf16 %v75_v7, %v74_v6  ;;  %v711_v11 = vld [vmem:[#allocation2] sm:$0xff]  ;;  %v170_v12 = vld [vmem:[#allocation7] sm:$0xff]  ;;  %v171_v13 = vld [vmem:[#allocation7 + $0x8] sm:$0xff]  ;;  %v457_v20 = vpack.c.bf16 %v77_v10, %v76_v9  ;;  %v271_v1 = vand.u32 127, %v270_v0  ;;  %p586_p10 = scmp.ne.s32.totalorder %s323_s22, %s585_s23  ;;  %p591_p12 = scmp.lt.s32.totalorder %s585_s23, %s585_s23 }
  0x3a   :  { %448 = vmatpush3.bf16.msra.mxu0 %v445_v3  ;;  %407 = vmatprep.mubr.f32.mxu0 %v711_v11  ;;  %v172_v14 = vld [vmem:[#allocation7 + $0x10] sm:$0xff]  ;;  %v477_v15 = vpack.c.bf16 %v171_v13, %v170_v12  ;;  %v173_v16 = vld [vmem:[#allocation7 + $0x18] sm:$0xff]  ;;  %v174_v18 = vld [vmem:[#allocation7 + $0x20] sm:$0xff] }
  0x3b   :  { %450 = vmatprep.subr.bf16.mxu0 %v449_v5  ;;  %v481_v17 = vpack.c.bf16 %v173_v16, %v172_v14  ;;  %v175_v19 = vld [vmem:[#allocation7 + $0x28] sm:$0xff]  ;;  %v78_v21 = vld [vmem:[#allocation5 + $0x40] sm:$0xff]  ;;  %v176_v24 = vld [vmem:[#allocation7 + $0x30] sm:$0xff]  ;;  %vm272_vm0 = vcmp.lt.s32.totalorder %v271_v1, 32  ;;  %p592_p13 = por %p591_p12, %p590_p11 }
  0x3c   :  { %478 = vmatprep.subr.bf16.mxu1 %v477_v15  ;;  %v79_v22 = vld [vmem:[#allocation5 + $0x48] sm:$0xff]  ;;  %v485_v23 = vpack.c.bf16 %v175_v19, %v174_v18  ;;  %v177_v25 = vld [vmem:[#allocation7 + $0x38] sm:$0xff]  ;;  %v80_v27 = vld [vmem:[#allocation5 + $0x50] sm:$0xff] }
  0x3d   :  { %480 = vmatpush3.bf16.msra.mxu1 %v477_v15  ;;  %v461_v26 = vpack.c.bf16 %v79_v22, %v78_v21  ;;  %v81_v28 = vld [vmem:[#allocation5 + $0x58] sm:$0xff]  ;;  %v489_v29 = vpack.c.bf16 %v177_v25, %v176_v24  ;;  %v178_v30 = vld [vmem:[#allocation7 + $0x40] sm:$0xff]  ;;  %v179_v31 = vld [vmem:[#allocation7 + $0x48] sm:$0xff]  ;;  %p593_p0 = pnand %p592_p13, %p586_p10 }
  0x3e   :  { %452 = vmatpush3.bf16.msra.mxu0 %v449_v5  ;;  %482 = vmatprep.subr.bf16.mxu1 %v481_v17  ;;  %v465_v32 = vpack.c.bf16 %v81_v28, %v80_v27  ;;  %v82_v33 = vld [vmem:[#allocation5 + $0x60] sm:$0xff]  ;;  %v83_v34 = vld [vmem:[#allocation5 + $0x68] sm:$0xff]  ;;  %v493_v35 = vpack.c.bf16 %v179_v31, %v178_v30  ;;  %v180_v36 = vld [vmem:[#allocation7 + $0x50] sm:$0xff] }
  0x3f   :  { %454 = vmatprep.subr.bf16.mxu0 %v453_v8  ;;  %v181_v37 = vld [vmem:[#allocation7 + $0x58] sm:$0xff]  ;;  %v469_v38 = vpack.c.bf16 %v83_v34, %v82_v33  ;;  %v84_v39 = vld [vmem:[#allocation5 + $0x70] sm:$0xff]  ;;  %v182_v42 = vld [vmem:[#allocation7 + $0x60] sm:$0xff] }
  0x40   :  { %v85_v40 = vld [vmem:[#allocation5 + $0x78] sm:$0xff]  ;;  %v497_v41 = vpack.c.bf16 %v181_v37, %v180_v36  ;;  %v183_v43 = vld [vmem:[#allocation7 + $0x68] sm:$0xff]  ;;  %v184_v47 = vld [vmem:[#allocation7 + $0x70] sm:$0xff] }
  0x41   :  { %484 = vmatpush3.bf16.msra.mxu1 %v481_v17  ;;  %v473_v44 = vpack.c.bf16 %v85_v40, %v84_v39  ;;  %v501_v45 = vpack.c.bf16 %v183_v43, %v182_v42  ;;  %v69_v46 = vld [vmem:[#allocation2 + $0x8] sm:$0xff]  ;;  %v335_v50 = vld [vmem:[%s744_s2] ss:$0 sm:$0xff] }
  0x42   :  { %456 = vmatpush3.bf16.msra.mxu0 %v453_v8  ;;  %486 = vmatprep.subr.bf16.mxu1 %v485_v23  ;;  %v185_v48 = vld [vmem:[#allocation7 + $0x78] sm:$0xff]  ;;  %v336_v57 = vld [vmem:[%s746_s4] ss:$0 sm:$0xff] }
  0x43   :  { %458 = vmatprep.subr.bf16.mxu0 %v457_v20  ;;  %v505_v49 = vpack.c.bf16 %v185_v48, %v184_v47  ;;  %v337_v19 = vld [vmem:[%s747_s5] ss:$0 sm:$0xff] }
  0x44   :  { %v338_v21 = vld [vmem:[%s748_s6] ss:$0 sm:$0xff] }
  0x45   :  { %488 = vmatpush3.bf16.msra.mxu1 %v485_v23 }
  0x46   :  { %460 = vmatpush3.bf16.msra.mxu0 %v457_v20  ;;  %490 = vmatprep.subr.bf16.mxu1 %v489_v29 }
  0x47   :  { %462 = vmatprep.subr.bf16.mxu0 %v461_v26 }
  0x49   :  { %492 = vmatpush3.bf16.msra.mxu1 %v489_v29 }
  0x4a   :  { %464 = vmatpush3.bf16.msra.mxu0 %v461_v26  ;;  %494 = vmatprep.subr.bf16.mxu1 %v493_v35 }
  0x4b   :  { %466 = vmatprep.subr.bf16.mxu0 %v465_v32 }
  0x4d   :  { %496 = vmatpush3.bf16.msra.mxu1 %v493_v35 }
  0x4e   :  { %468 = vmatpush3.bf16.msra.mxu0 %v465_v32  ;;  %498 = vmatprep.subr.bf16.mxu1 %v497_v41 }
  0x4f   :  { %470 = vmatprep.subr.bf16.mxu0 %v469_v38 }
  0x51   :  { %500 = vmatpush3.bf16.msra.mxu1 %v497_v41 }
  0x52   :  { %472 = vmatpush3.bf16.msra.mxu0 %v469_v38  ;;  %502 = vmatprep.subr.bf16.mxu1 %v501_v45 }
  0x53   :  { %474 = vmatprep.subr.bf16.mxu0 %v473_v44 }
  0x55   :  { %504 = vmatpush3.bf16.msra.mxu1 %v501_v45 }
  0x56   :  { %476 = vmatpush3.bf16.msra.mxu0 %v473_v44  ;;  %506 = vmatprep.subr.bf16.mxu1 %v505_v49 }
  0x59   :  { %408 = vmatmul.mubr.f32.vlgmr.msra.gmra.mrb[0].mxu0 %v69_v46  ;;  %508 = vmatpush3.bf16.msra.mxu1 %v505_v49 }
 0x12c   :  { %v409_v51 = vpop.f32.mrb[0].mxu0 }
 0x12d   :  { %v165_v52 = vadd.f32 %v409_v51, %v335_v50  ;;  %v159_v53 = vpop.f32.mrb[1].mxu0 }
 0x12e   :  { %v160_v54 = vadd.f32 %v335_v50, %v159_v53 }
 0x12f   :  { %v169_v56 = vmax.f32 %v165_v52, 0.0 }
 0x130   :  { %v168_v55 = vmax.f32 %v160_v54, 0.0 }
 0x132   :  { %442 = vmatprep.mubr.f32.mxu1 %v168_v55 }
 0x133   :  { %443 = vmatmul.mubr.f32.vlgmr.msra.gmra.mrb[0].mxu1 %v169_v56 }
 0x206   :  { %v444_v58 = vpop.f32.mrb[0].mxu1 }
 0x207   :  { %v259_v59 = vpop.f32.mrb[1].mxu1  ;;  %v265_v61 = vadd.f32 %v444_v58, %v336_v57 }
 0x208   :  { %v260_v60 = vadd.f32 %v336_v57, %v259_v59 }
 0x209   :  { %v269_v63 = vadd.f32 %v265_v61, %v69_v46 }
 0x20a   :  { %v268_v62 = vadd.f32 %v260_v60, %v711_v11 }
 0x20c   :  { %273 = vadd.xlane.f32.xlu0 %v268_v62 }
 0x210   :  { %275 = vadd.xlane.f32.xlu0 %v269_v63 }
 0x299   :  { %v274_v2 = vpop.xlane.xlu0 %273 }
 0x29a   :  { %v277_v3 = vmul.f32 0.03125, %v274_v2 }
 0x29c   :  { %v279_v4 = vsub.f32 %v268_v62, %v277_v3 }
 0x29d   :  { %v276_v5 = vpop.xlane.xlu0 %275 }
 0x29e   :  { %v278_v6 = vmul.f32 0.03125, %v276_v5  ;;  %v281_v7 = vsel %vm272_vm0, %v279_v4, 0.0 }
 0x29f   :  { %v283_v8 = vmul.f32 %v281_v7, %v281_v7 }
 0x2a0   :  { %v280_v9 = vsub.f32 %v269_v63, %v278_v6 }
 0x2a1   :  { %285 = vadd.xlane.f32.xlu1 %v283_v8 }
 0x2a2   :  { %v282_v10 = vsel %vm272_vm0, %v280_v9, 0.0 }
 0x2a3   :  { %v284_v12 = vmul.f32 %v282_v10, %v282_v10 }
 0x2a5   :  { %287 = vadd.xlane.f32.xlu1 %v284_v12 }
 0x32e   :  { %v286_v13 = vpop.xlane.xlu1 %285 }
 0x32f   :  { %v289_v11 = vmul.f32 0.03125, %v286_v13 }
 0x331   :  { %v291_v14 = vadd.f32 1e-05, %v289_v11 }
 0x332   :  { %v288_v15 = vpop.xlane.xlu1 %287 }
 0x333   :  { %515 = vrsqrt.f32 %v291_v14  ;;  %v290_v16 = vmul.f32 0.03125, %v288_v15 }
 0x335   :  { %v292_v17 = vadd.f32 1e-05, %v290_v16 }
 0x337   :  { %517 = vrsqrt.f32 %v292_v17 }
 0x33d   :  { %v516_v18 = vpop.eup %515 }
 0x33e   :  { %v295_v20 = vmul.f32 %v516_v18, %v281_v7 }
 0x340   :  { %v304_v22 = vmul.f32 %v337_v19, %v295_v20 }
 0x341   :  { %v518_v23 = vpop.eup %517 }
 0x342   :  { %v296_v24 = vmul.f32 %v518_v23, %v282_v10  ;;  %v313_v25 = vadd.f32 %v338_v21, %v304_v22 }
 0x344   :  { %v305_v26 = vmul.f32 %v337_v19, %v296_v24  ;;  %315 = vst [vmem:[#allocation8] sm:$0xff] %v313_v25 }
 0x346   :  { %v314_v27 = vadd.f32 %v338_v21, %v305_v26 }
 0x348   :  { %316 = vst [vmem:[#allocation8 + $0x8] sm:$0xff] %v314_v27 }
 0x349   :  { %596 = shalt.err (!%p593_p0)
}
 0x34a   :  { %s597_s24 = scalar_lea.hbm %s749_s7, 256 }
 0x34b   :  { %p598_p1 = scmp.ne.s32.totalorder %s749_s7, %s597_s24  ;;  %p601_p2 = scmp.lt.u32.totalorder %s597_s24, %s749_s7 }
 0x34d   :  { %p603_p3 = pnand %p601_p2, %p598_p1 }
 0x34f   :  { %606 = shalt.err (!%p603_p3)
}
 0x350   :  { %328 = dma.vmem_to_hbm [thread:$0]  %s323_s22, 256, %s749_s7, [#allocation4], %s615_s13, %s615_s13, %s616_s14  }
 0x351   :  { %611 = dma.done.wait [#allocation4], 256  }
 0x352   :  { %612 = vsyncadd [#allocation4], 4294967040 }
 0x353   :  { %332 = vsyncpa [#allocation3], 1 }
 0x354   :  { %333 = vsyncpa [#allocation6], 1 }
 0x355   :  { %334 = vsyncpa [#allocation4], 1 }

// kernel: tpu_custom_call.1
= control target key start
LH: loop header
LB: loop body
LE: loop exit
PB: predicated region body
PF: predicated region fallthrough
CT: control target
= control target key end

     0   :  { %12 = vsyncpa [#allocation3], 0  ;;  %s742_s0 = inlined_call_operand.hbm [shape: f32[16,128], index: 0, kind: input, shape index: {}]   ;;  %s743_s1 = inlined_call_operand.hbm [shape: f32[128,128], index: 1, kind: input, shape index: {}]   ;;  %s744_s2 = inlined_call_operand.vmem [shape: f32[1,128], index: 2, kind: input, shape index: {}]   ;;  %s745_s3 = inlined_call_operand.hbm [shape: f32[128,128], index: 3, kind: input, shape index: {}]   ;;  %s746_s4 = inlined_call_operand.vmem [shape: f32[1,128], index: 4, kind: input, shape index: {}]   ;;  %s747_s5 = inlined_call_operand.vmem [shape: f32[1,128], index: 5, kind: input, shape index: {}]   ;;  %s748_s6 = inlined_call_operand.vmem [shape: f32[1,128], index: 6, kind: input, shape index: {}]   ;;  %s749_s7 = inlined_call_operand.hbm [shape: f32[16,128], index: 7, kind: output, shape index: {}]  }
   0x1   :  { %13 = vsyncpa [#allocation6], 0 }
   0x2   :  { %14 = vsyncpa [#allocation4], 0  ;;  %s613_s24 = smov [#allocation5]   ;;  %s614_s26 = smov [#allocation2]  }
   0x3   :  { %s32_s25 = sshll.u32 %s613_s24, 4  ;;  %s20_s27 = sshll.u32 %s614_s26, 4  ;;  %s33_s25 = int_to_ptr.vmem [resolvable:$true] %s32_s25  ;;  %s659_s27 = int_to_ptr.vmem [resolvable:$true] %s20_s27 }
   0x4   :  { %s519_s30 = scalar_lea.hbm %s743_s1, 2048 }
   0x5   :  { %p520_p0 = scmp.ne.s32.totalorder %s743_s1, %s519_s30  ;;  %p523_p1 = scmp.lt.u32.totalorder %s519_s30, %s743_s1 }
   0x7   :  { %p525_p2 = pnand %p523_p1, %p520_p0 }
   0x9   :  { %528 = shalt.err (!%p525_p2)
}
   0xa   :  { %s529_s12 = scalar_lea.vmem %s33_s25, 2048  ;;  %p534_p4 = scmp.lt.s32.totalorder %s33_s25, %s33_s25 }
   0xb   :  { %p530_p3 = scmp.ne.s32.totalorder %s33_s25, %s529_s12  ;;  %p535_p5 = scmp.lt.s32.totalorder %s529_s12, %s529_s12 }
   0xd   :  { %p536_p6 = por %p535_p5, %p534_p4 }
   0xf   :  { %p537_p7 = pnand %p536_p6, %p530_p3 }
  0x11   :  { %540 = shalt.err (!%p537_p7)
}
  0x12   :  { %s615_s13 = smov 128   ;;  %s616_s14 = smov 8  }
  0x13   :  { %38 = dma.hbm_to_vmem [thread:$0]  %s743_s1, 2048, %s33_s25, [#allocation6], %s615_s13, %s615_s13, %s616_s14  }
  0x14   :  { %s541_s19 = scalar_lea.hbm %s742_s0, 256 }
  0x15   :  { %p542_p8 = scmp.ne.s32.totalorder %s742_s0, %s541_s19  ;;  %p545_p9 = scmp.lt.u32.totalorder %s541_s19, %s742_s0 }
  0x17   :  { %p547_p10 = pnand %p545_p9, %p542_p8 }
  0x19   :  { %550 = shalt.err (!%p547_p10)
}
  0x1a   :  { %s551_s24 = scalar_lea.vmem %s659_s27, 256  ;;  %p556_p12 = scmp.lt.s32.totalorder %s659_s27, %s659_s27 }
  0x1b   :  { %p552_p11 = scmp.ne.s32.totalorder %s659_s27, %s551_s24  ;;  %p557_p13 = scmp.lt.s32.totalorder %s551_s24, %s551_s24 }
  0x1d   :  { %p558_p0 = por %p557_p13, %p556_p12 }
  0x1f   :  { %p559_p1 = pnand %p558_p0, %p552_p11 }
  0x21   :  { %562 = shalt.err (!%p559_p1)
}
  0x22   :  { %26 = dma.hbm_to_vmem [thread:$0]  %s742_s0, 256, %s659_s27, [#allocation3], %s615_s13, %s615_s13, %s616_s14  }
  0x23   :  { %s617_s26 = smov [#allocation7]   ;;  %s563_s8 = scalar_lea.hbm %s745_s3, 2048 }
  0x24   :  { %s46_s28 = sshll.u32 %s617_s26, 4  ;;  %p564_p2 = scmp.ne.s32.totalorder %s745_s3, %s563_s8  ;;  %s47_s28 = int_to_ptr.vmem [resolvable:$true] %s46_s28 }
  0x25   :  { %p567_p3 = scmp.lt.u32.totalorder %s563_s8, %s745_s3 }
  0x27   :  { %p569_p4 = pnand %p567_p3, %p564_p2 }
  0x29   :  { %572 = shalt.err (!%p569_p4)
}
  0x2a   :  { %s573_s15 = scalar_lea.vmem %s47_s28, 2048  ;;  %p578_p6 = scmp.lt.s32.totalorder %s47_s28, %s47_s28 }
  0x2b   :  { %p574_p5 = scmp.ne.s32.totalorder %s47_s28, %s573_s15  ;;  %p579_p7 = scmp.lt.s32.totalorder %s573_s15, %s573_s15 }
  0x2d   :  { %p580_p8 = por %p579_p7, %p578_p6 }
  0x2f   :  { %p581_p9 = pnand %p580_p8, %p574_p5 }
  0x31   :  { %584 = shalt.err (!%p581_p9)
}
  0x32   :  { %52 = dma.hbm_to_vmem [thread:$0]  %s745_s3, 2048, %s47_s28, [#allocation6], %s615_s13, %s615_s13, %s616_s14  }
  0x33   :  { %607 = dma.done.wait [#allocation3], 256  }
  0x34   :  { %608 = vsyncadd [#allocation3], 4294967040 }
  0x35   :  { %609 = dma.done.wait [#allocation6], 4096  }
  0x36   :  { %610 = vsyncadd [#allocation6], 4294963200  ;;  %v70_v0 = vld [vmem:[#allocation5] sm:$0xff]  ;;  %v71_v1 = vld [vmem:[#allocation5 + $0x8] sm:$0xff]  ;;  %s618_s21 = smov [#allocation8]  }
  0x37   :  { %v72_v2 = vld [vmem:[#allocation5 + $0x10] sm:$0xff]  ;;  %v445_v3 = vpack.c.bf16 %v71_v1, %v70_v0  ;;  %v73_v4 = vld [vmem:[#allocation5 + $0x18] sm:$0xff]  ;;  %v74_v6 = vld [vmem:[#allocation5 + $0x20] sm:$0xff]  ;;  %v270_v0 = vlaneseq  ;;  %s322_s22 = sshll.u32 %s618_s21, 4  ;;  %s323_s22 = int_to_ptr.vmem [resolvable:$true] %s322_s22 }
  0x38   :  { %v449_v5 = vpack.c.bf16 %v73_v4, %v72_v2  ;;  %v75_v7 = vld [vmem:[#allocation5 + $0x28] sm:$0xff]  ;;  %v76_v9 = vld [vmem:[#allocation5 + $0x30] sm:$0xff]  ;;  %v77_v10 = vld [vmem:[#allocation5 + $0x38] sm:$0xff]  ;;  %s585_s23 = scalar_lea.vmem %s323_s22, 256  ;;  %p590_p11 = scmp.lt.s32.totalorder %s323_s22, %s323_s22 }
  0x39   :  { %446 = vmatprep.subr.bf16.mxu0 %v445_v3  ;;  %v453_v8 = vpack.c.bf16 %v75_v7, %v74_v6  ;;  %v711_v11 = vld [vmem:[#allocation2] sm:$0xff]  ;;  %v170_v12 = vld [vmem:[#allocation7] sm:$0xff]  ;;  %v171_v13 = vld [vmem:[#allocation7 + $0x8] sm:$0xff]  ;;  %v457_v20 = vpack.c.bf16 %v77_v10, %v76_v9  ;;  %v271_v1 = vand.u32 127, %v270_v0  ;;  %p586_p10 = scmp.ne.s32.totalorder %s323_s22, %s585_s23  ;;  %p591_p12 = scmp.lt.s32.totalorder %s585_s23, %s585_s23 }
  0x3a   :  { %448 = vmatpush3.bf16.msra.mxu0 %v445_v3  ;;  %407 = vmatprep.mubr.f32.mxu0 %v711_v11  ;;  %v172_v14 = vld [vmem:[#allocation7 + $0x10] sm:$0xff]  ;;  %v477_v15 = vpack.c.bf16 %v171_v13, %v170_v12  ;;  %v173_v16 = vld [vmem:[#allocation7 + $0x18] sm:$0xff]  ;;  %v174_v18 = vld [vmem:[#allocation7 + $0x20] sm:$0xff] }
  0x3b   :  { %450 = vmatprep.subr.bf16.mxu0 %v449_v5  ;;  %v481_v17 = vpack.c.bf16 %v173_v16, %v172_v14  ;;  %v175_v19 = vld [vmem:[#allocation7 + $0x28] sm:$0xff]  ;;  %v78_v21 = vld [vmem:[#allocation5 + $0x40] sm:$0xff]  ;;  %v176_v24 = vld [vmem:[#allocation7 + $0x30] sm:$0xff]  ;;  %vm272_vm0 = vcmp.lt.s32.totalorder %v271_v1, 32  ;;  %p592_p13 = por %p591_p12, %p590_p11 }
  0x3c   :  { %478 = vmatprep.subr.bf16.mxu1 %v477_v15  ;;  %v79_v22 = vld [vmem:[#allocation5 + $0x48] sm:$0xff]  ;;  %v485_v23 = vpack.c.bf16 %v175_v19, %v174_v18  ;;  %v177_v25 = vld [vmem:[#allocation7 + $0x38] sm:$0xff]  ;;  %v80_v27 = vld [vmem:[#allocation5 + $0x50] sm:$0xff] }
  0x3d   :  { %480 = vmatpush3.bf16.msra.mxu1 %v477_v15  ;;  %v461_v26 = vpack.c.bf16 %v79_v22, %v78_v21  ;;  %v81_v28 = vld [vmem:[#allocation5 + $0x58] sm:$0xff]  ;;  %v489_v29 = vpack.c.bf16 %v177_v25, %v176_v24  ;;  %v178_v30 = vld [vmem:[#allocation7 + $0x40] sm:$0xff]  ;;  %v179_v31 = vld [vmem:[#allocation7 + $0x48] sm:$0xff]  ;;  %p593_p0 = pnand %p592_p13, %p586_p10 }
  0x3e   :  { %452 = vmatpush3.bf16.msra.mxu0 %v449_v5  ;;  %482 = vmatprep.subr.bf16.mxu1 %v481_v17  ;;  %v465_v32 = vpack.c.bf16 %v81_v28, %v80_v27  ;;  %v82_v33 = vld [vmem:[#allocation5 + $0x60] sm:$0xff]  ;;  %v83_v34 = vld [vmem:[#allocation5 + $0x68] sm:$0xff]  ;;  %v493_v35 = vpack.c.bf16 %v179_v31, %v178_v30  ;;  %v180_v36 = vld [vmem:[#allocation7 + $0x50] sm:$0xff] }
  0x3f   :  { %454 = vmatprep.subr.bf16.mxu0 %v453_v8  ;;  %v181_v37 = vld [vmem:[#allocation7 + $0x58] sm:$0xff]  ;;  %v469_v38 = vpack.c.bf16 %v83_v34, %v82_v33  ;;  %v84_v39 = vld [vmem:[#allocation5 + $0x70] sm:$0xff]  ;;  %v182_v42 = vld [vmem:[#allocation7 + $0x60] sm:$0xff] }
  0x40   :  { %v85_v40 = vld [vmem:[#allocation5 + $0x78] sm:$0xff]  ;;  %v497_v41 = vpack.c.bf16 %v181_v37, %v180_v36  ;;  %v183_v43 = vld [vmem:[#allocation7 + $0x68] sm:$0xff]  ;;  %v184_v47 = vld [vmem:[#allocation7 + $0x70] sm:$0xff] }
  0x41   :  { %484 = vmatpush3.bf16.msra.mxu1 %v481_v17  ;;  %v473_v44 = vpack.c.bf16 %v85_v40, %v84_v39  ;;  %v501_v45 = vpack.c.bf16 %v183_v43, %v182_v42  ;;  %v69_v46 = vld [vmem:[#allocation2 + $0x8] sm:$0xff]  ;;  %v335_v50 = vld [vmem:[%s744_s2] ss:$0 sm:$0xff] }
  0x42   :  { %456 = vmatpush3.bf16.msra.mxu0 %v453_v8  ;;  %486 = vmatprep.subr.bf16.mxu1 %v485_v23  ;;  %v185_v48 = vld [vmem:[#allocation7 + $0x78] sm:$0xff]  ;;  %v336_v57 = vld [vmem:[%s746_s4] ss:$0 sm:$0xff] }
  0x43   :  { %458 = vmatprep.subr.bf16.mxu0 %v457_v20  ;;  %v505_v49 = vpack.c.bf16 %v185_v48, %v184_v47  ;;  %v337_v19 = vld [vmem:[%s747_s5] ss:$0 sm:$0xff] }
  0x44   :  { %v338_v21 = vld [vmem:[%s748_s6] ss:$0 sm:$0xff] }
  0x45   :  { %488 = vmatpush3.bf16.msra.mxu1 %v485_v23 }
  0x46   :  { %460 = vmatpush3.bf16.msra.mxu0 %v457_v20  ;;  %490 = vmatprep.subr.bf16.mxu1 %v489_v29 }
  0x47   :  { %462 = vmatprep.subr.bf16.mxu0 %v461_v26 }
  0x49   :  { %492 = vmatpush3.bf16.msra.mxu1 %v489_v29 }
  0x4a   :  { %464 = vmatpush3.bf16.msra.mxu0 %v461_v26  ;;  %494 = vmatprep.subr.bf16.mxu1 %v493_v35 }
  0x4b   :  { %466 = vmatprep.subr.bf16.mxu0 %v465_v32 }
  0x4d   :  { %496 = vmatpush3.bf16.msra.mxu1 %v493_v35 }
  0x4e   :  { %468 = vmatpush3.bf16.msra.mxu0 %v465_v32  ;;  %498 = vmatprep.subr.bf16.mxu1 %v497_v41 }
  0x4f   :  { %470 = vmatprep.subr.bf16.mxu0 %v469_v38 }
  0x51   :  { %500 = vmatpush3.bf16.msra.mxu1 %v497_v41 }
  0x52   :  { %472 = vmatpush3.bf16.msra.mxu0 %v469_v38  ;;  %502 = vmatprep.subr.bf16.mxu1 %v501_v45 }
  0x53   :  { %474 = vmatprep.subr.bf16.mxu0 %v473_v44 }
  0x55   :  { %504 = vmatpush3.bf16.msra.mxu1 %v501_v45 }
  0x56   :  { %476 = vmatpush3.bf16.msra.mxu0 %v473_v44  ;;  %506 = vmatprep.subr.bf16.mxu1 %v505_v49 }
  0x59   :  { %408 = vmatmul.mubr.f32.vlgmr.msra.gmra.mrb[0].mxu0 %v69_v46  ;;  %508 = vmatpush3.bf16.msra.mxu1 %v505_v49 }
 0x12c   :  { %v409_v51 = vpop.f32.mrb[0].mxu0 }
 0x12d   :  { %v165_v52 = vadd.f32 %v409_v51, %v335_v50  ;;  %v159_v53 = vpop.f32.mrb[1].mxu0 }
 0x12e   :  { %v160_v54 = vadd.f32 %v335_v50, %v159_v53 }
 0x12f   :  { %v169_v56 = vmax.f32 %v165_v52, 0.0 }
 0x130   :  { %v168_v55 = vmax.f32 %v160_v54, 0.0 }
 0x132   :  { %442 = vmatprep.mubr.f32.mxu1 %v168_v55 }
 0x133   :  { %443 = vmatmul.mubr.f32.vlgmr.msra.gmra.mrb[0].mxu1 %v169_v56 }
 0x206   :  { %v444_v58 = vpop.f32.mrb[0].mxu1 }
 0x207   :  { %v259_v59 = vpop.f32.mrb[1].mxu1  ;;  %v265_v61 = vadd.f32 %v444_v58, %v336_v57 }
 0x208   :  { %v260_v60 = vadd.f32 %v336_v57, %v259_v59 }
 0x209   :  { %v269_v63 = vadd.f32 %v265_v61, %v69_v46 }
 0x20a   :  { %v268_v62 = vadd.f32 %v260_v60, %v711_v11 }
 0x20c   :  { %273 = vadd.xlane.f32.xlu0 %v268_v62 }
 0x210   :  { %275 = vadd.xlane.f32.xlu0 %v269_v63 }
 0x299   :  { %v274_v2 = vpop.xlane.xlu0 %273 }
 0x29a   :  { %v277_v3 = vmul.f32 0.03125, %v274_v2 }
 0x29c   :  { %v279_v4 = vsub.f32 %v268_v62, %v277_v3 }
 0x29d   :  { %v276_v5 = vpop.xlane.xlu0 %275 }
 0x29e   :  { %v278_v6 = vmul.f32 0.03125, %v276_v5  ;;  %v281_v7 = vsel %vm272_vm0, %v279_v4, 0.0 }
 0x29f   :  { %v283_v8 = vmul.f32 %v281_v7, %v281_v7 }
 0x2a0   :  { %v280_v9 = vsub.f32 %v269_v63, %v278_v6 }
 0x2a1   :  { %285 = vadd.xlane.f32.xlu1 %v283_v8 }
 0x2a2   :  { %v282_v10 = vsel %vm272_vm0, %v280_v9, 0.0 }
 0x2a3   :  { %v284_v12 = vmul.f32 %v282_v10, %v282_v10 }
 0x2a5   :  { %287 = vadd.xlane.f32.xlu1 %v284_v12 }
 0x32e   :  { %v286_v13 = vpop.xlane.xlu1 %285 }
 0x32f   :  { %v289_v11 = vmul.f32 0.03125, %v286_v13 }
 0x331   :  { %v291_v14 = vadd.f32 1e-05, %v289_v11 }
 0x332   :  { %v288_v15 = vpop.xlane.xlu1 %287 }
 0x333   :  { %515 = vrsqrt.f32 %v291_v14  ;;  %v290_v16 = vmul.f32 0.03125, %v288_v15 }
 0x335   :  { %v292_v17 = vadd.f32 1e-05, %v290_v16 }
 0x337   :  { %517 = vrsqrt.f32 %v292_v17 }
 0x33d   :  { %v516_v18 = vpop.eup %515 }
 0x33e   :  { %v295_v20 = vmul.f32 %v516_v18, %v281_v7 }
 0x340   :  { %v304_v22 = vmul.f32 %v337_v19, %v295_v20 }
 0x341   :  { %v518_v23 = vpop.eup %517 }
 0x342   :  { %v296_v24 = vmul.f32 %v518_v23, %v282_v10  ;;  %v313_v25 = vadd.f32 %v338_v21, %v304_v22 }
 0x344   :  { %v305_v26 = vmul.f32 %v337_v19, %v296_v24  ;;  %315 = vst [vmem:[#allocation8] sm:$0xff] %v313_v25 }
 0x346   :  { %v314_v27 = vadd.f32 %v338_v21, %v305_v26 }
 0x348   :  { %316 = vst [vmem:[#allocation8 + $0x8] sm:$0xff] %v314_v27 }
 0x349   :  { %596 = shalt.err (!%p593_p0)
}
 0x34a   :  { %s597_s24 = scalar_lea.hbm %s749_s7, 256 }
 0x34b   :  { %p598_p1 = scmp.ne.s32.totalorder %s749_s7, %s597_s24  ;;  %p601_p2 = scmp.lt.u32.totalorder %s597_s24, %s749_s7 }
 0x34d   :  { %p603_p3 = pnand %p601_p2, %p598_p1 }
 0x34f   :  { %606 = shalt.err (!%p603_p3)
}
 0x350   :  { %328 = dma.vmem_to_hbm [thread:$0]  %s323_s22, 256, %s749_s7, [#allocation4], %s615_s13, %s615_s13, %s616_s14  }
 0x351   :  { %611 = dma.done.wait [#allocation4], 256  }
 0x352   :  { %612 = vsyncadd [#allocation4], 4294967040 }
 0x353   :  { %332 = vsyncpa [#allocation3], 1 }
 0x354   :  { %333 = vsyncpa [#allocation6], 1 }
 0x355   :  { %334 = vsyncpa [#allocation4], 1 }

</bundles_post_ra>
